<compile_context>
chip_gen: v7x
topology: tpu7x:2x2x1
jax: 0.10.0
libtpu: 0.0.40
codegen_flags: <defaults>
</compile_context>

<pallas_src>
import math

import jax
import jax.numpy as jnp
from jax import lax
from jax.experimental import pallas as pl
from jax.experimental.pallas import tpu as pltpu


def _round_up(x, m):
    return ((x + m - 1) // m) * m


def _pick_tile(b):
    # Lane-dense tile that always divides the padded batch.  128 keeps the toy
    # case a single grid point; 256 is a safe production default across
    # v5e/v6e/v7x VMEM budgets (raise to 512 on v6e for very large batches).
    return 128 if b <= 128 else 256


# ---------------------------------------------------------------------------
# Stage A: per-row projection + complex rotation (+ row norms).  Runs once per
# row, so the pairwise grid never touches the Linear weights again.
# ---------------------------------------------------------------------------
def project_rotate_kernel(head_ref, tail_ref, rre_ref, rim_ref,
                          wre_ref, wim_ref, bre_ref, bim_ref,
                          htre_ref, htim_ref, tre_ref, tim_ref,
                          hn_ref, tn_ref):
    wre = wre_ref[...]                       # (h, h), (in, out) layout
    wim = wim_ref[...]
    bre = bre_ref[...]                       # (1, h)
    bim = bim_ref[...]

    head = head_ref[...]                     # (tm, h)
    tail = tail_ref[...]                     # (tm, h)

    h_re = jnp.dot(head, wre, preferred_element_type=jnp.float32) + bre
    h_im = jnp.dot(head, wim, preferred_element_type=jnp.float32) + bim
    t_re = jnp.dot(tail, wre, preferred_element_type=jnp.float32) + bre
    t_im = jnp.dot(tail, wim, preferred_element_type=jnp.float32) + bim

    # Complex rotation of the head projection by the relation phase
    # (cos/sin were precomputed on the tiny relation table in the wrapper).
    rre = rre_ref[...]
    rim = rim_ref[...]
    ht_re = rre * h_re - rim * h_im
    ht_im = rre * h_im + rim * h_re

    htre_ref[...] = ht_re
    htim_ref[...] = ht_im
    tre_ref[...] = t_re
    tim_ref[...] = t_im
    hn_ref[...] = jnp.sum(ht_re * ht_re + ht_im * ht_im, axis=-1, keepdims=True)
    tn_ref[...] = jnp.sum(t_re * t_re + t_im * t_im, axis=-1, keepdims=True)


# ---------------------------------------------------------------------------
# Stage B: pairwise scores via the Gram expansion, entirely on the MXU.
#   ||ht_i - t_j||^2 = ||ht_i||^2 + ||t_j||^2 - 2 (<ht_re_i, t_re_j> + <ht_im_i, t_im_j>)
# ---------------------------------------------------------------------------
_NT_DIMS = (((1,), (1,)), ((), ()))          # contract last dims of both operands


def pairwise_kernel(htre_ref, htim_ref, tre_ref, tim_ref, hn_ref, tn_ref,
                    out_ref):
    gram = lax.dot_general(htre_ref[...], tre_ref[...], _NT_DIMS,
                           preferred_element_type=jnp.float32)
    gram = gram + lax.dot_general(htim_ref[...], tim_ref[...], _NT_DIMS,
                                  preferred_element_type=jnp.float32)
    # hn: (ti, 1) column, tn: (1, tj) row -> pure VPU broadcast adds (no XLU).
    sq = hn_ref[...] + tn_ref[...] - 2.0 * gram
    # Clamp: cancellation can push sq slightly negative for near-identical rows.
    out_ref[...] = jnp.sqrt(jnp.maximum(sq, 0.0))


def rotate_transformation(head_emb, tail_emb, rel_idx,
                          w_relation, w_real, b_real, w_image, b_image,
                          *, mxu_dtype=jnp.float32):
    """head_emb, tail_emb: (b, h) f32; rel_idx: (b,) i32; w_relation: (num_rels, h).

    Weights are stored (in, out), so the kernels compute x @ W + b
    (== PyTorch's x @ W_pt.T + b).  `mxu_dtype=jnp.bfloat16` speeds up the
    pairwise Gram dots on v6e/v7x at a small precision cost.
    """
    b, h = head_emb.shape

    # Hoist transcendentals onto the tiny relation table, then gather per row.
    rel_re = jnp.cos(w_relation)[rel_idx]                    # (b, h)
    rel_im = jnp.sin(w_relation)[rel_idx]                    # (b, h)

    tile = _pick_tile(b)
    bp = _round_up(b, tile)

    def pad_rows(x):
        return x if x.shape[0] == bp else jnp.pad(x, ((0, bp - x.shape[0]), (0, 0)))

    head_p = pad_rows(head_emb)
    tail_p = pad_rows(tail_emb)
    relre_p = pad_rows(rel_re)
    relim_p = pad_rows(rel_im)
    bre = b_real[None, :]                                    # (1, h)
    bim = b_image[None, :]                                   # (1, h)

    # ---- Stage A: project + rotate each row once ----
    row_spec = pl.BlockSpec((tile, h), lambda i: (i, 0))
    w_spec = pl.BlockSpec((h, h), lambda i: (0, 0))          # resident weights
    b_spec = pl.BlockSpec((1, h), lambda i: (0, 0))          # resident biases
    n_spec = pl.BlockSpec((tile, 1), lambda i: (i, 0))

    ht_re, ht_im, t_re, t_im, hn, tn_col = pl.pallas_call(
        project_rotate_kernel,
        out_shape=(
            jax.ShapeDtypeStruct((bp, h), jnp.float32),
            jax.ShapeDtypeStruct((bp, h), jnp.float32),
            jax.ShapeDtypeStruct((bp, h), jnp.float32),
            jax.ShapeDtypeStruct((bp, h), jnp.float32),
            jax.ShapeDtypeStruct((bp, 1), jnp.float32),
            jax.ShapeDtypeStruct((bp, 1), jnp.float32),
        ),
        grid_spec=pltpu.PrefetchScalarGridSpec(
            num_scalar_prefetch=0,
            grid=(bp // tile,),
            in_specs=[row_spec, row_spec, row_spec, row_spec,
                      w_spec, w_spec, b_spec, b_spec],
            out_specs=[row_spec, row_spec, row_spec, row_spec, n_spec, n_spec],
        ),
        compiler_params=pltpu.CompilerParams(
            dimension_semantics=("parallel",)),
    )(head_p, tail_p, relre_p, relim_p, w_real, w_image, bre, bim)

    # One cheap wrapper-side relayout, outside the hot pairwise loop.
    tn_row = tn_col.reshape(1, bp)

    if mxu_dtype != jnp.float32:
        # bf16 Gram operands for v6e/v7x; norms / sqrt stay f32.
        ht_re = ht_re.astype(mxu_dtype)
        ht_im = ht_im.astype(mxu_dtype)
        t_re = t_re.astype(mxu_dtype)
        t_im = t_im.astype(mxu_dtype)

    # ---- Stage B: pairwise score tiles ----
    grid_n = bp // tile
    itm = jnp.dtype(mxu_dtype).itemsize
    cost = pl.CostEstimate(
        flops=4 * bp * bp * h + 4 * bp * bp,
        transcendentals=bp * bp,
        bytes_accessed=4 * bp * h * itm * grid_n + 2 * bp * 4 + bp * bp * 4,
    )

    out = pl.pallas_call(
        pairwise_kernel,
        out_shape=jax.ShapeDtypeStruct((bp, bp), jnp.float32),
        grid_spec=pltpu.PrefetchScalarGridSpec(
            num_scalar_prefetch=0,
            grid=(grid_n, grid_n),
            in_specs=[
                pl.BlockSpec((tile, h), lambda i, j: (i, 0)),   # ht_re block
                pl.BlockSpec((tile, h), lambda i, j: (i, 0)),   # ht_im block
                pl.BlockSpec((tile, h), lambda i, j: (j, 0)),   # t_re block
                pl.BlockSpec((tile, h), lambda i, j: (j, 0)),   # t_im block
                pl.BlockSpec((tile, 1), lambda i, j: (i, 0)),   # head norms (col)
                pl.BlockSpec((1, tile), lambda i, j: (0, j)),   # tail norms (row)
            ],
            out_specs=pl.BlockSpec((tile, tile), lambda i, j: (i, j)),
        ),
        compiler_params=pltpu.CompilerParams(
            dimension_semantics=("parallel", "parallel")),
        cost_estimate=cost,
    )(ht_re, ht_im, t_re, t_im, hn, tn_row)

    return out[:b, :b]


def reference(head_emb, tail_emb, rel_idx,
              w_relation, w_real, b_real, w_image, b_image):
    rel_theta = w_relation[rel_idx]
    rel_re, rel_im = jnp.cos(rel_theta), jnp.sin(rel_theta)
    head_re = head_emb @ w_real + b_real
    head_im = head_emb @ w_image + b_image
    tail_re = tail_emb @ w_real + b_real
    tail_im = tail_emb @ w_image + b_image
    ht_re = (rel_re * head_re - rel_im * head_im)[:, None, :]
    ht_im = (rel_re * head_im + rel_im * head_re)[:, None, :]
    re_score = ht_re - tail_re[None, :, :]
    im_score = ht_im - tail_im[None, :, :]
    return jnp.sqrt(jnp.sum(re_score ** 2 + im_score ** 2, axis=-1))


if __name__ == "__main__":
    B = 8          # batch
    H = 32         # embedding_dim
    NUM_RELS = 5

    key = jax.random.PRNGKey(0)
    k_head, k_tail, k_rel, k_wre, k_wim, k_bre, k_bim, k_theta = jax.random.split(key, 8)

    head_emb = jax.random.normal(k_head, (B, H), dtype=jnp.float32)
    tail_emb = jax.random.normal(k_tail, (B, H), dtype=jnp.float32)
    rel_idx = jax.random.randint(k_rel, (B,), 0, NUM_RELS, dtype=jnp.int32)

    # Parameter init matching the module's reset_parameters (deterministic, synthetic):
    #   node_emb_* weights: xavier_uniform over (H, H); biases: U(-1/sqrt(H), 1/sqrt(H))
    #   w_relation: U(0, 2*pi)
    xav = math.sqrt(6.0 / (H + H))
    w_real = jax.random.uniform(k_wre, (H, H), minval=-xav, maxval=xav, dtype=jnp.float32)
    w_image = jax.random.uniform(k_wim, (H, H), minval=-xav, maxval=xav, dtype=jnp.float32)
    bb = 1.0 / math.sqrt(H)
    b_real = jax.random.uniform(k_bre, (H,), minval=-bb, maxval=bb, dtype=jnp.float32)
    b_image = jax.random.uniform(k_bim, (H,), minval=-bb, maxval=bb, dtype=jnp.float32)
    w_relation = jax.random.uniform(k_theta, (NUM_RELS, H), minval=0.0,
                                    maxval=2.0 * math.pi, dtype=jnp.float32)

    score = rotate_transformation(head_emb, tail_emb, rel_idx,
                                  w_relation, w_real, b_real, w_image, b_image)
    score = jax.block_until_ready(score)

    ref = reference(head_emb, tail_emb, rel_idx,
                    w_relation, w_real, b_real, w_image, b_image)
    assert score.shape == (B, B)
    assert jnp.allclose(score, ref, atol=1e-3, rtol=1e-3), "mismatch vs JAX reference"

    print("KERNEL_OK")
</pallas_src>

<mosaic_0001>
module attributes {stable_mosaic.version = 11 : i64} {
  func.func @project_rotate_kernel(%arg0: i32, %arg1: memref<128x32xf32, #tpu.memory_space<vmem>>, %arg2: memref<128x32xf32, #tpu.memory_space<vmem>>, %arg3: memref<128x32xf32, #tpu.memory_space<vmem>>, %arg4: memref<128x32xf32, #tpu.memory_space<vmem>>, %arg5: memref<32x32xf32, #tpu.memory_space<vmem>>, %arg6: memref<32x32xf32, #tpu.memory_space<vmem>>, %arg7: memref<1x32xf32, #tpu.memory_space<vmem>>, %arg8: memref<1x32xf32, #tpu.memory_space<vmem>>, %arg9: memref<128x32xf32, #tpu.memory_space<vmem>>, %arg10: memref<128x32xf32, #tpu.memory_space<vmem>>, %arg11: memref<128x32xf32, #tpu.memory_space<vmem>>, %arg12: memref<128x32xf32, #tpu.memory_space<vmem>>, %arg13: memref<128x1xf32, #tpu.memory_space<vmem>>, %arg14: memref<128x1xf32, #tpu.memory_space<vmem>>) attributes {dimension_semantics = [#tpu.dimension_semantics<parallel>], iteration_bounds = array<i64: 1>, scalar_prefetch = 0 : i64, scratch_operands = 0 : i64, tpu.core_type = #tpu.core_type<tc>, window_params = [{transform_indices = @transform_0, window_bounds = array<i64: 128, 32>}, {transform_indices = @transform_1, window_bounds = array<i64: 128, 32>}, {transform_indices = @transform_2, window_bounds = array<i64: 128, 32>}, {transform_indices = @transform_3, window_bounds = array<i64: 128, 32>}, {pipeline_mode = #tpu.pipeline_mode<synchronous>, transform_indices = @transform_4, window_bounds = array<i64: 32, 32>}, {pipeline_mode = #tpu.pipeline_mode<synchronous>, transform_indices = @transform_5, window_bounds = array<i64: 32, 32>}, {pipeline_mode = #tpu.pipeline_mode<synchronous>, transform_indices = @transform_6, window_bounds = array<i64: 1, 32>}, {pipeline_mode = #tpu.pipeline_mode<synchronous>, transform_indices = @transform_7, window_bounds = array<i64: 1, 32>}, {transform_indices = @transform_8, window_bounds = array<i64: 128, 32>}, {transform_indices = @transform_9, window_bounds = array<i64: 128, 32>}, {transform_indices = @transform_10, window_bounds = array<i64: 128, 32>}, {transform_indices = @transform_11, window_bounds = array<i64: 128, 32>}, {transform_indices = @transform_12, window_bounds = array<i64: 128, 1>}, {transform_indices = @transform_13, window_bounds = array<i64: 128, 1>}]} {
    %c0 = arith.constant 0 : index
    %c0_0 = arith.constant 0 : index
    %0 = vector.load %arg5[%c0, %c0_0] : memref<32x32xf32, #tpu.memory_space<vmem>>, vector<32x32xf32>
    %c0_1 = arith.constant 0 : index
    %c0_2 = arith.constant 0 : index
    %1 = vector.load %arg6[%c0_1, %c0_2] : memref<32x32xf32, #tpu.memory_space<vmem>>, vector<32x32xf32>
    %c0_3 = arith.constant 0 : index
    %c0_4 = arith.constant 0 : index
    %2 = vector.load %arg7[%c0_3, %c0_4] : memref<1x32xf32, #tpu.memory_space<vmem>>, vector<1x32xf32>
    %c0_5 = arith.constant 0 : index
    %c0_6 = arith.constant 0 : index
    %3 = vector.load %arg8[%c0_5, %c0_6] : memref<1x32xf32, #tpu.memory_space<vmem>>, vector<1x32xf32>
    %c0_7 = arith.constant 0 : index
    %c0_8 = arith.constant 0 : index
    %4 = vector.load %arg1[%c0_7, %c0_8] : memref<128x32xf32, #tpu.memory_space<vmem>>, vector<128x32xf32>
    %c0_9 = arith.constant 0 : index
    %c0_10 = arith.constant 0 : index
    %5 = vector.load %arg2[%c0_9, %c0_10] : memref<128x32xf32, #tpu.memory_space<vmem>>, vector<128x32xf32>
    %cst = arith.constant dense<0.000000e+00> : vector<128x32xf32>
    %6 = tpu.matmul %4, %0, %cst {dimension_numbers = #tpu.dot_dimension_numbers<[1], [0], [0], [1], [0, 0, 1, 1], [], []>} : vector<128x32xf32>, vector<32x32xf32>, vector<128x32xf32> -> vector<128x32xf32>
    %7 = vector.broadcast %2 : vector<1x32xf32> to vector<128x32xf32>
    %8 = arith.addf %6, %7 : vector<128x32xf32>
    %cst_11 = arith.constant dense<0.000000e+00> : vector<128x32xf32>
    %9 = tpu.matmul %4, %1, %cst_11 {dimension_numbers = #tpu.dot_dimension_numbers<[1], [0], [0], [1], [0, 0, 1, 1], [], []>} : vector<128x32xf32>, vector<32x32xf32>, vector<128x32xf32> -> vector<128x32xf32>
    %10 = vector.broadcast %3 : vector<1x32xf32> to vector<128x32xf32>
    %11 = arith.addf %9, %10 : vector<128x32xf32>
    %cst_12 = arith.constant dense<0.000000e+00> : vector<128x32xf32>
    %12 = tpu.matmul %5, %0, %cst_12 {dimension_numbers = #tpu.dot_dimension_numbers<[1], [0], [0], [1], [0, 0, 1, 1], [], []>} : vector<128x32xf32>, vector<32x32xf32>, vector<128x32xf32> -> vector<128x32xf32>
    %13 = vector.broadcast %2 : vector<1x32xf32> to vector<128x32xf32>
    %14 = arith.addf %12, %13 : vector<128x32xf32>
    %cst_13 = arith.constant dense<0.000000e+00> : vector<128x32xf32>
    %15 = tpu.matmul %5, %1, %cst_13 {dimension_numbers = #tpu.dot_dimension_numbers<[1], [0], [0], [1], [0, 0, 1, 1], [], []>} : vector<128x32xf32>, vector<32x32xf32>, vector<128x32xf32> -> vector<128x32xf32>
    %16 = vector.broadcast %3 : vector<1x32xf32> to vector<128x32xf32>
    %17 = arith.addf %15, %16 : vector<128x32xf32>
    %c0_14 = arith.constant 0 : index
    %c0_15 = arith.constant 0 : index
    %18 = vector.load %arg3[%c0_14, %c0_15] : memref<128x32xf32, #tpu.memory_space<vmem>>, vector<128x32xf32>
    %c0_16 = arith.constant 0 : index
    %c0_17 = arith.constant 0 : index
    %19 = vector.load %arg4[%c0_16, %c0_17] : memref<128x32xf32, #tpu.memory_space<vmem>>, vector<128x32xf32>
    %20 = arith.mulf %18, %8 : vector<128x32xf32>
    %21 = arith.mulf %19, %11 : vector<128x32xf32>
    %22 = arith.subf %20, %21 : vector<128x32xf32>
    %23 = arith.mulf %18, %11 : vector<128x32xf32>
    %24 = arith.mulf %19, %8 : vector<128x32xf32>
    %25 = arith.addf %23, %24 : vector<128x32xf32>
    %c0_18 = arith.constant 0 : index
    %c0_19 = arith.constant 0 : index
    %26 = vector.load %arg9[%c0_18, %c0_19] : memref<128x32xf32, #tpu.memory_space<vmem>>, vector<128x32xf32>
    tpu.vector_store %arg9[%c0_18, %c0_19], %22 {strides = array<i32>} : memref<128x32xf32, #tpu.memory_space<vmem>>, vector<128x32xf32>,
    %c0_20 = arith.constant 0 : index
    %c0_21 = arith.constant 0 : index
    %27 = vector.load %arg10[%c0_20, %c0_21] : memref<128x32xf32, #tpu.memory_space<vmem>>, vector<128x32xf32>
    tpu.vector_store %arg10[%c0_20, %c0_21], %25 {strides = array<i32>} : memref<128x32xf32, #tpu.memory_space<vmem>>, vector<128x32xf32>,
    %c0_22 = arith.constant 0 : index
    %c0_23 = arith.constant 0 : index
    %28 = vector.load %arg11[%c0_22, %c0_23] : memref<128x32xf32, #tpu.memory_space<vmem>>, vector<128x32xf32>
    tpu.vector_store %arg11[%c0_22, %c0_23], %14 {strides = array<i32>} : memref<128x32xf32, #tpu.memory_space<vmem>>, vector<128x32xf32>,
    %c0_24 = arith.constant 0 : index
    %c0_25 = arith.constant 0 : index
    %29 = vector.load %arg12[%c0_24, %c0_25] : memref<128x32xf32, #tpu.memory_space<vmem>>, vector<128x32xf32>
    tpu.vector_store %arg12[%c0_24, %c0_25], %17 {strides = array<i32>} : memref<128x32xf32, #tpu.memory_space<vmem>>, vector<128x32xf32>,
    %30 = arith.mulf %22, %22 : vector<128x32xf32>
    %31 = arith.mulf %25, %25 : vector<128x32xf32>
    %32 = arith.addf %30, %31 : vector<128x32xf32>
    %cst_26 = arith.constant dense<0.000000e+00> : vector<128xf32>
    %33 = vector.multi_reduction <add>, %32, %cst_26 [1] : vector<128x32xf32> to vector<128xf32>
    %34 = vector.shape_cast %33 : vector<128xf32> to vector<128x1xf32>
    %c0_27 = arith.constant 0 : index
    %c0_28 = arith.constant 0 : index
    %35 = vector.load %arg13[%c0_27, %c0_28] : memref<128x1xf32, #tpu.memory_space<vmem>>, vector<128x1xf32>
    tpu.vector_store %arg13[%c0_27, %c0_28], %34 {strides = array<i32>} : memref<128x1xf32, #tpu.memory_space<vmem>>, vector<128x1xf32>,
    %36 = arith.mulf %14, %14 : vector<128x32xf32>
    %37 = arith.mulf %17, %17 : vector<128x32xf32>
    %38 = arith.addf %36, %37 : vector<128x32xf32>
    %cst_29 = arith.constant dense<0.000000e+00> : vector<128xf32>
    %39 = vector.multi_reduction <add>, %38, %cst_29 [1] : vector<128x32xf32> to vector<128xf32>
    %40 = vector.shape_cast %39 : vector<128xf32> to vector<128x1xf32>
    %c0_30 = arith.constant 0 : index
    %c0_31 = arith.constant 0 : index
    %41 = vector.load %arg14[%c0_30, %c0_31] : memref<128x1xf32, #tpu.memory_space<vmem>>, vector<128x1xf32>
    tpu.vector_store %arg14[%c0_30, %c0_31], %40 {strides = array<i32>} : memref<128x1xf32, #tpu.memory_space<vmem>>, vector<128x1xf32>,
    return
  }
  func.func @transform_0(%arg0: i32) -> (i32, i32) {
    %c0_i32 = arith.constant 0 : i32
    %c0_i32_0 = arith.constant 0 : i32
    return %arg0, %c0_i32 : i32, i32
  }
  func.func @transform_1(%arg0: i32) -> (i32, i32) {
    %c0_i32 = arith.constant 0 : i32
    %c0_i32_0 = arith.constant 0 : i32
    return %arg0, %c0_i32 : i32, i32
  }
  func.func @transform_2(%arg0: i32) -> (i32, i32) {
    %c0_i32 = arith.constant 0 : i32
    %c0_i32_0 = arith.constant 0 : i32
    return %arg0, %c0_i32 : i32, i32
  }
  func.func @transform_3(%arg0: i32) -> (i32, i32) {
    %c0_i32 = arith.constant 0 : i32
    %c0_i32_0 = arith.constant 0 : i32
    return %arg0, %c0_i32 : i32, i32
  }
  func.func @transform_4(%arg0: i32) -> (i32, i32) {
    %c0_i32 = arith.constant 0 : i32
    %c0_i32_0 = arith.constant 0 : i32
    %c0_i32_1 = arith.constant 0 : i32
    return %c0_i32, %c0_i32_0 : i32, i32
  }
  func.func @transform_5(%arg0: i32) -> (i32, i32) {
    %c0_i32 = arith.constant 0 : i32
    %c0_i32_0 = arith.constant 0 : i32
    %c0_i32_1 = arith.constant 0 : i32
    return %c0_i32, %c0_i32_0 : i32, i32
  }
  func.func @transform_6(%arg0: i32) -> (i32, i32) {
    %c0_i32 = arith.constant 0 : i32
    %c0_i32_0 = arith.constant 0 : i32
    %c0_i32_1 = arith.constant 0 : i32
    return %c0_i32, %c0_i32_0 : i32, i32
  }
  func.func @transform_7(%arg0: i32) -> (i32, i32) {
    %c0_i32 = arith.constant 0 : i32
    %c0_i32_0 = arith.constant 0 : i32
    %c0_i32_1 = arith.constant 0 : i32
    return %c0_i32, %c0_i32_0 : i32, i32
  }
  func.func @transform_8(%arg0: i32) -> (i32, i32) {
    %c0_i32 = arith.constant 0 : i32
    %c0_i32_0 = arith.constant 0 : i32
    return %arg0, %c0_i32 : i32, i32
  }
  func.func @transform_9(%arg0: i32) -> (i32, i32) {
    %c0_i32 = arith.constant 0 : i32
    %c0_i32_0 = arith.constant 0 : i32
    return %arg0, %c0_i32 : i32, i32
  }
  func.func @transform_10(%arg0: i32) -> (i32, i32) {
    %c0_i32 = arith.constant 0 : i32
    %c0_i32_0 = arith.constant 0 : i32
    return %arg0, %c0_i32 : i32, i32
  }
  func.func @transform_11(%arg0: i32) -> (i32, i32) {
    %c0_i32 = arith.constant 0 : i32
    %c0_i32_0 = arith.constant 0 : i32
    return %arg0, %c0_i32 : i32, i32
  }
  func.func @transform_12(%arg0: i32) -> (i32, i32) {
    %c0_i32 = arith.constant 0 : i32
    %c0_i32_0 = arith.constant 0 : i32
    return %arg0, %c0_i32 : i32, i32
  }
  func.func @transform_13(%arg0: i32) -> (i32, i32) {
    %c0_i32 = arith.constant 0 : i32
    %c0_i32_0 = arith.constant 0 : i32
    return %arg0, %c0_i32 : i32, i32
  }
}

</mosaic_0001>

<bundles_post_ra>
// kernel: tpu_custom_call.1
= control target key start
LH: loop header
LB: loop body
LE: loop exit
PB: predicated region body
PF: predicated region fallthrough
CT: control target
= control target key end

     0   :  { %vm83_vm0 = vcmask 261120   ;;  %vm1054_vm1 = vcmask 7168   ;;  %s2561_s4 = inlined_call_operand.vmem [shape: f32[32,32], index: 4, kind: input, shape index: {}]   ;;  %s2562_s5 = inlined_call_operand.vmem [shape: f32[32,32], index: 5, kind: input, shape index: {}]   ;;  %s2563_s0 = inlined_call_operand.vmem [shape: f32[128,32], index: 0, kind: input, shape index: {}]   ;;  %s2564_s1 = inlined_call_operand.vmem [shape: f32[128,32], index: 1, kind: input, shape index: {}]   ;;  %s2565_s6 = inlined_call_operand.vmem [shape: f32[1,32], index: 6, kind: input, shape index: {}]   ;;  %s2566_s7 = inlined_call_operand.vmem [shape: f32[1,32], index: 7, kind: input, shape index: {}]   ;;  %s2567_s2 = inlined_call_operand.vmem [shape: f32[128,32], index: 2, kind: input, shape index: {}]   ;;  %s2568_s3 = inlined_call_operand.vmem [shape: f32[128,32], index: 3, kind: input, shape index: {}]   ;;  %s2569_s8 = inlined_call_operand.vmem [shape: f32[128,32], index: 8, kind: output, shape index: {0}]   ;;  %s2570_s9 = inlined_call_operand.vmem [shape: f32[128,32], index: 9, kind: output, shape index: {1}]   ;;  %s2571_s10 = inlined_call_operand.vmem [shape: f32[128,32], index: 10, kind: output, shape index: {2}]   ;;  %s2572_s11 = inlined_call_operand.vmem [shape: f32[128,32], index: 11, kind: output, shape index: {3}]   ;;  %s2573_s12 = inlined_call_operand.vmem [shape: f32[128,1], index: 12, kind: output, shape index: {4}]   ;;  %s2574_s13 = inlined_call_operand.vmem [shape: f32[128,1], index: 13, kind: output, shape index: {5}]  }
   0x1   :  { %v35_v0 = vld [vmem:[%s2561_s4] sm:$0xff]  ;;  %v36_v1 = vld [vmem:[%s2561_s4 + $0x8] sm:$0xff]  ;;  %v37_v5 = vld [vmem:[%s2561_s4 + $0x10] sm:$0xff] }
   0x2   :  { %v39_v2 = vld [vmem:[%s2562_s5] sm:$0xff]  ;;  %v1481_v3 = vpack.c.bf16 %v36_v1, %v35_v0  ;;  %v40_v4 = vld [vmem:[%s2562_s5 + $0x8] sm:$0xff]  ;;  %v38_v6 = vld [vmem:[%s2561_s4 + $0x18] sm:$0xff] }
   0x3   :  { %v1489_v7 = vpack.c.bf16 %v40_v4, %v39_v2  ;;  %v1485_v8 = vpack.c.bf16 %v38_v6, %v37_v5  ;;  %v41_v9 = vld [vmem:[%s2562_s5 + $0x10] sm:$0xff]  ;;  %v42_v10 = vld [vmem:[%s2562_s5 + $0x18] sm:$0xff]  ;;  %v45_v11 = vld [vmem:[%s2563_s0] sm:$0xff] }
   0x4   :  { %1482 = vmatprep.subr.bf16.mxu0 %v1481_v3  ;;  %v1493_v12 = vpack.c.bf16 %v42_v10, %v41_v9  ;;  %1361 = vmatprep.mubr.msk.f32.mxu0 %vm83_vm0, %v45_v11  ;;  %v46_v13 = vld [vmem:[%s2563_s0 + $0x8] sm:$0xff]  ;;  %v47_v14 = vld [vmem:[%s2563_s0 + $0x10] sm:$0xff]  ;;  %v48_v15 = vld [vmem:[%s2563_s0 + $0x18] sm:$0xff] }
   0x5   :  { %1490 = vmatprep.subr.bf16.mxu1 %v1489_v7  ;;  %1484 = vmatpush3.bf16.msra.mxu0 %v1481_v3  ;;  %v49_v16 = vld [vmem:[%s2563_s0 + $0x20] sm:$0xff]  ;;  %v50_v17 = vld [vmem:[%s2563_s0 + $0x28] sm:$0xff]  ;;  %v51_v18 = vld [vmem:[%s2563_s0 + $0x30] sm:$0xff] }
   0x6   :  { %1492 = vmatpush3.bf16.msra.mxu1 %v1489_v7  ;;  %1486 = vmatprep.subr.bf16.mxu0 %v1485_v8  ;;  %v52_v19 = vld [vmem:[%s2563_s0 + $0x38] sm:$0xff]  ;;  %v53_v20 = vld [vmem:[%s2563_s0 + $0x40] sm:$0xff]  ;;  %v54_v21 = vld [vmem:[%s2563_s0 + $0x48] sm:$0xff] }
   0x7   :  { %1494 = vmatprep.subr.bf16.mxu1 %v1493_v12  ;;  %1393 = vmatprep.mubr.msk.f32.mxu1 %vm83_vm0, %v45_v11  ;;  %v55_v22 = vld [vmem:[%s2563_s0 + $0x50] sm:$0xff]  ;;  %v56_v23 = vld [vmem:[%s2563_s0 + $0x58] sm:$0xff]  ;;  %v57_v24 = vld [vmem:[%s2563_s0 + $0x60] sm:$0xff] }
   0x8   :  { %v58_v25 = vld [vmem:[%s2563_s0 + $0x68] sm:$0xff]  ;;  %v59_v26 = vld [vmem:[%s2563_s0 + $0x70] sm:$0xff]  ;;  %v60_v27 = vld [vmem:[%s2563_s0 + $0x78] sm:$0xff] }
   0x9   :  { %1488 = vmatpush3.bf16.msra.mxu0 %v1485_v8  ;;  %v61_v28 = vld [vmem:[%s2564_s1] sm:$0xff]  ;;  %v62_v29 = vld [vmem:[%s2564_s1 + $0x8] sm:$0xff]  ;;  %v63_v30 = vld [vmem:[%s2564_s1 + $0x10] sm:$0xff] }
   0xa   :  { %1496 = vmatpush3.bf16.msra.mxu1 %v1493_v12  ;;  %1498 = vmatprep.subr.bf16.mxu0 %v1481_v3  ;;  %v64_v31 = vld [vmem:[%s2564_s1 + $0x18] sm:$0xff]  ;;  %v65_v32 = vld [vmem:[%s2564_s1 + $0x20] sm:$0xff]  ;;  %v66_v33 = vld [vmem:[%s2564_s1 + $0x28] sm:$0xff] }
   0xb   :  { %1506 = vmatprep.subr.bf16.mxu1 %v1489_v7  ;;  %v67_v34 = vld [vmem:[%s2564_s1 + $0x30] sm:$0xff]  ;;  %v68_v35 = vld [vmem:[%s2564_s1 + $0x38] sm:$0xff]  ;;  %v69_v36 = vld [vmem:[%s2564_s1 + $0x40] sm:$0xff] }
   0xc   :  { %1362 = vmatmul.mubr.msk.f32.vlgmr.msra.gmra.mrb[0].mxu0 %vm83_vm0, %v46_v13  ;;  %v70_v37 = vld [vmem:[%s2564_s1 + $0x48] sm:$0xff]  ;;  %v71_v38 = vld [vmem:[%s2564_s1 + $0x50] sm:$0xff]  ;;  %v72_v39 = vld [vmem:[%s2564_s1 + $0x58] sm:$0xff] }
   0xd   :  { %1394 = vmatmul.mubr.msk.f32.vlgmr.msra.gmra.mrb[0].mxu1 %vm83_vm0, %v46_v13  ;;  %1364 = vmatprep.mubr.msk.f32.mxu0 %vm83_vm0, %v47_v14  ;;  %v73_v40 = vld [vmem:[%s2564_s1 + $0x60] sm:$0xff]  ;;  %v74_v41 = vld [vmem:[%s2564_s1 + $0x68] sm:$0xff]  ;;  %v75_v42 = vld [vmem:[%s2564_s1 + $0x70] sm:$0xff] }
   0xe   :  { %1396 = vmatprep.mubr.msk.f32.mxu1 %vm83_vm0, %v47_v14  ;;  %1500 = vmatpush3.bf16.msra.mxu0 %v1481_v3  ;;  %v76_v43 = vld [vmem:[%s2564_s1 + $0x78] sm:$0xff]  ;;  %v1770_v44 = vld [vmem:[%s2565_s6] ss:$0 sm:$0xff]  ;;  %v767_v47 = vld [vmem:[%s2567_s2 + $0x8] sm:$0xff] }
   0xf   :  { %1508 = vmatpush3.bf16.msra.mxu1 %v1489_v7  ;;  %1502 = vmatprep.subr.bf16.mxu0 %v1485_v8  ;;  %v1775_v45 = vld [vmem:[%s2566_s7] ss:$0 sm:$0xff]  ;;  %v783_v48 = vld [vmem:[%s2568_s3 + $0x8] sm:$0xff]  ;;  %v769_v1 = vld [vmem:[%s2567_s2 + $0x18] sm:$0xff] }
  0x10   :  { %1365 = vmatmul.mubr.msk.f32.gmra.mrb[2].mxu0 %vm83_vm0, %v48_v15  ;;  %1510 = vmatprep.subr.bf16.mxu1 %v1493_v12  ;;  %v766_v52 = vld [vmem:[%s2567_s2] sm:$0xff]  ;;  %v785_v2 = vld [vmem:[%s2568_s3 + $0x18] sm:$0xff]  ;;  %v784_v9 = vld [vmem:[%s2568_s3 + $0x10] sm:$0xff] }
  0x11   :  { %1397 = vmatmul.mubr.msk.f32.gmra.mrb[2].mxu1 %vm83_vm0, %v48_v15  ;;  %1367 = vmatprep.mubr.msk.f32.mxu0 %vm83_vm0, %v49_v16  ;;  %v782_v53 = vld [vmem:[%s2568_s3] sm:$0xff] }
  0x12   :  { %1399 = vmatprep.mubr.msk.f32.mxu1 %vm83_vm0, %v49_v16  ;;  %1504 = vmatpush3.bf16.msra.mxu0 %v1485_v8  ;;  %v768_v8 = vld [vmem:[%s2567_s2 + $0x10] sm:$0xff] }
  0x13   :  { %1512 = vmatpush3.bf16.msra.mxu1 %v1493_v12 }
  0x14   :  { %1368 = vmatmul.mubr.msk.f32.gmra.mrb[4].mxu0 %vm83_vm0, %v50_v17 }
  0x15   :  { %1400 = vmatmul.mubr.msk.f32.gmra.mrb[4].mxu1 %vm83_vm0, %v50_v17  ;;  %1370 = vmatprep.mubr.msk.f32.mxu0 %vm83_vm0, %v51_v18 }
  0x16   :  { %1402 = vmatprep.mubr.msk.f32.mxu1 %vm83_vm0, %v51_v18 }
  0x18   :  { %1371 = vmatmul.mubr.msk.f32.gmra.mrb[6].mxu0 %vm83_vm0, %v52_v19 }
  0x19   :  { %1403 = vmatmul.mubr.msk.f32.gmra.mrb[6].mxu1 %vm83_vm0, %v52_v19  ;;  %1373 = vmatprep.mubr.msk.f32.mxu0 %vm83_vm0, %v53_v20 }
  0x1a   :  { %1405 = vmatprep.mubr.msk.f32.mxu1 %vm83_vm0, %v53_v20 }
  0x1c   :  { %1374 = vmatmul.mubr.msk.f32.gmra.mrb[8].mxu0 %vm83_vm0, %v54_v21 }
  0x1d   :  { %1406 = vmatmul.mubr.msk.f32.gmra.mrb[8].mxu1 %vm83_vm0, %v54_v21  ;;  %1376 = vmatprep.mubr.msk.f32.mxu0 %vm83_vm0, %v55_v22 }
  0x1e   :  { %1408 = vmatprep.mubr.msk.f32.mxu1 %vm83_vm0, %v55_v22 }
  0x20   :  { %1377 = vmatmul.mubr.msk.f32.gmra.mrb[10].mxu0 %vm83_vm0, %v56_v23 }
  0x21   :  { %1409 = vmatmul.mubr.msk.f32.gmra.mrb[10].mxu1 %vm83_vm0, %v56_v23  ;;  %1379 = vmatprep.mubr.msk.f32.mxu0 %vm83_vm0, %v57_v24 }
  0x22   :  { %1411 = vmatprep.mubr.msk.f32.mxu1 %vm83_vm0, %v57_v24  ;;  %v771_v24 = vld [vmem:[%s2567_s2 + $0x28] sm:$0xff] }
  0x24   :  { %1380 = vmatmul.mubr.msk.f32.gmra.mrb[12].mxu0 %vm83_vm0, %v58_v25 }
  0x25   :  { %1412 = vmatmul.mubr.msk.f32.gmra.mrb[12].mxu1 %vm83_vm0, %v58_v25  ;;  %1382 = vmatprep.mubr.msk.f32.mxu0 %vm83_vm0, %v59_v26  ;;  %v787_v25 = vld [vmem:[%s2568_s3 + $0x28] sm:$0xff] }
  0x26   :  { %1414 = vmatprep.mubr.msk.f32.mxu1 %vm83_vm0, %v59_v26 }
  0x28   :  { %1383 = vmatmul.mubr.msk.f32.gmra.mrb[14].mxu0 %vm83_vm0, %v60_v27 }
  0x29   :  { %1415 = vmatmul.mubr.msk.f32.gmra.mrb[14].mxu1 %vm83_vm0, %v60_v27  ;;  %1425 = vmatprep.mubr.msk.f32.mxu0 %vm83_vm0, %v61_v28 }
  0x2a   :  { %1457 = vmatprep.mubr.msk.f32.mxu1 %vm83_vm0, %v61_v28 }
  0x2c   :  { %1426 = vmatmul.mubr.msk.f32.vlgmr.msra.gmra.mrb[16].mxu0 %vm83_vm0, %v62_v29 }
  0x2d   :  { %1458 = vmatmul.mubr.msk.f32.vlgmr.msra.gmra.mrb[16].mxu1 %vm83_vm0, %v62_v29  ;;  %1428 = vmatprep.mubr.msk.f32.mxu0 %vm83_vm0, %v63_v30 }
  0x2e   :  { %1460 = vmatprep.mubr.msk.f32.mxu1 %vm83_vm0, %v63_v30  ;;  %v770_v30 = vld [vmem:[%s2567_s2 + $0x20] sm:$0xff] }
  0x30   :  { %1429 = vmatmul.mubr.msk.f32.gmra.mrb[18].mxu0 %vm83_vm0, %v64_v31 }
  0x31   :  { %1461 = vmatmul.mubr.msk.f32.gmra.mrb[18].mxu1 %vm83_vm0, %v64_v31  ;;  %1431 = vmatprep.mubr.msk.f32.mxu0 %vm83_vm0, %v65_v32  ;;  %v786_v31 = vld [vmem:[%s2568_s3 + $0x20] sm:$0xff] }
  0x32   :  { %1463 = vmatprep.mubr.msk.f32.mxu1 %vm83_vm0, %v65_v32 }
  0x34   :  { %1432 = vmatmul.mubr.msk.f32.gmra.mrb[20].mxu0 %vm83_vm0, %v66_v33 }
  0x35   :  { %1464 = vmatmul.mubr.msk.f32.gmra.mrb[20].mxu1 %vm83_vm0, %v66_v33  ;;  %1434 = vmatprep.mubr.msk.f32.mxu0 %vm83_vm0, %v67_v34 }
  0x36   :  { %1466 = vmatprep.mubr.msk.f32.mxu1 %vm83_vm0, %v67_v34 }
  0x38   :  { %1435 = vmatmul.mubr.msk.f32.gmra.mrb[22].mxu0 %vm83_vm0, %v68_v35 }
  0x39   :  { %1467 = vmatmul.mubr.msk.f32.gmra.mrb[22].mxu1 %vm83_vm0, %v68_v35  ;;  %1437 = vmatprep.mubr.msk.f32.mxu0 %vm83_vm0, %v69_v36 }
  0x3a   :  { %1469 = vmatprep.mubr.msk.f32.mxu1 %vm83_vm0, %v69_v36 }
  0x3c   :  { %1438 = vmatmul.mubr.msk.f32.gmra.mrb[24].mxu0 %vm83_vm0, %v70_v37 }
  0x3d   :  { %1470 = vmatmul.mubr.msk.f32.gmra.mrb[24].mxu1 %vm83_vm0, %v70_v37  ;;  %1440 = vmatprep.mubr.msk.f32.mxu0 %vm83_vm0, %v71_v38 }
  0x3e   :  { %1472 = vmatprep.mubr.msk.f32.mxu1 %vm83_vm0, %v71_v38 }
  0x40   :  { %1441 = vmatmul.mubr.msk.f32.gmra.mrb[26].mxu0 %vm83_vm0, %v72_v39 }
  0x41   :  { %1473 = vmatmul.mubr.msk.f32.gmra.mrb[26].mxu1 %vm83_vm0, %v72_v39  ;;  %1443 = vmatprep.mubr.msk.f32.mxu0 %vm83_vm0, %v73_v40 }
  0x42   :  { %1475 = vmatprep.mubr.msk.f32.mxu1 %vm83_vm0, %v73_v40 }
  0x44   :  { %1444 = vmatmul.mubr.msk.f32.gmra.mrb[28].mxu0 %vm83_vm0, %v74_v41 }
  0x45   :  { %1476 = vmatmul.mubr.msk.f32.gmra.mrb[28].mxu1 %vm83_vm0, %v74_v41  ;;  %1446 = vmatprep.mubr.msk.f32.mxu0 %vm83_vm0, %v75_v42 }
  0x46   :  { %1478 = vmatprep.mubr.msk.f32.mxu1 %vm83_vm0, %v75_v42 }
  0x48   :  { %1447 = vmatmul.mubr.msk.f32.gmra.mrb[30].mxu0 %vm83_vm0, %v76_v43 }
  0x49   :  { %1479 = vmatmul.mubr.msk.f32.gmra.mrb[30].mxu1 %vm83_vm0, %v76_v43 }
  0xdf   :  { %v1363_v46 = vpop.f32.mrb[0].mxu0 }
  0xe0   :  { %v204_v49 = vadd.f32 %v1363_v46, %v1770_v44  ;;  %v1395_v50 = vpop.f32.mrb[0].mxu1  ;;  %v198_v51 = vpop.f32.mrb[1].mxu0 }
  0xe1   :  { %v355_v54 = vadd.f32 %v1395_v50, %v1775_v45  ;;  %v199_v55 = vadd.f32 %v1770_v44, %v198_v51  ;;  %v349_v56 = vpop.f32.mrb[1].mxu1 }
  0xe2   :  { %v799_v57 = vmul.f32 %v767_v47, %v204_v49  ;;  %v863_v58 = vmul.f32 %v783_v48, %v204_v49  ;;  %v350_v59 = vadd.f32 %v1775_v45, %v349_v56 }
  0xe3   :  { %v815_v60 = vmul.f32 %v783_v48, %v355_v54  ;;  %v847_v61 = vmul.f32 %v767_v47, %v355_v54  ;;  %v798_v62 = vmul.f32 %v766_v52, %v199_v55  ;;  %v862_v63 = vmul.f32 %v782_v53, %v199_v55  ;;  %v1366_v0 = vpop.f32.mrb[2].mxu0  ;;  %v773_v54 = vld [vmem:[%s2567_s2 + $0x38] sm:$0xff] }
  0xe4   :  { %v814_v3 = vmul.f32 %v782_v53, %v350_v59  ;;  %v846_v4 = vmul.f32 %v766_v52, %v350_v59  ;;  %v214_v5 = vadd.f32 %v1366_v0, %v1770_v44  ;;  %v1398_v6 = vpop.f32.mrb[2].mxu1  ;;  %v208_v7 = vpop.f32.mrb[3].mxu0  ;;  %v789_v55 = vld [vmem:[%s2568_s3 + $0x38] sm:$0xff] }
  0xe5   :  { %v831_v10 = vsub.f32 %v799_v57, %v815_v60  ;;  %v879_v11 = vadd.f32 %v863_v58, %v847_v61  ;;  %v365_v12 = vadd.f32 %v1398_v6, %v1775_v45  ;;  %v209_v13 = vadd.f32 %v1770_v44, %v208_v7  ;;  %v359_v14 = vpop.f32.mrb[3].mxu1 }
  0xe6   :  { %v1808_v15 = vsub.f32 %v798_v62, %v814_v3  ;;  %v1810_v16 = vadd.f32 %v862_v63, %v846_v4  ;;  %v801_v17 = vmul.f32 %v769_v1, %v214_v5  ;;  %v865_v18 = vmul.f32 %v785_v2, %v214_v5  ;;  %v772_v62 = vld [vmem:[%s2567_s2 + $0x30] sm:$0xff] }
  0xe7   :  { %895 = vst.msk [vmem:[%s2569_s8 + $0x8] sm:$0xff] %vm83_vm0, %v831_v10  ;;  %911 = vst.msk [vmem:[%s2570_s9 + $0x8] sm:$0xff] %vm83_vm0, %v879_v11  ;;  %v817_v19 = vmul.f32 %v785_v2, %v365_v12  ;;  %v849_v20 = vmul.f32 %v769_v1, %v365_v12  ;;  %v800_v21 = vmul.f32 %v768_v8, %v209_v13  ;;  %v1369_v23 = vpop.f32.mrb[4].mxu0  ;;  %v788_v63 = vld [vmem:[%s2568_s3 + $0x30] sm:$0xff] }
  0xe8   :  { %v864_v22 = vmul.f32 %v784_v9, %v209_v13  ;;  %894 = vst.msk [vmem:[%s2569_s8] sm:$0xff] %vm83_vm0, %v1808_v15  ;;  %910 = vst.msk [vmem:[%s2570_s9] sm:$0xff] %vm83_vm0, %v1810_v16  ;;  %v360_v26 = vadd.f32 %v1775_v45, %v359_v14  ;;  %v224_v27 = vadd.f32 %v1369_v23, %v1770_v44  ;;  %v1401_v28 = vpop.f32.mrb[4].mxu1  ;;  %v218_v29 = vpop.f32.mrb[5].mxu0  ;;  %v791_v23 = vld [vmem:[%s2568_s3 + $0x48] sm:$0xff] }
  0xe9   :  { %v959_v32 = vmul.f32 %v831_v10, %v831_v10  ;;  %v975_v33 = vmul.f32 %v879_v11, %v879_v11  ;;  %v833_v34 = vsub.f32 %v801_v17, %v817_v19  ;;  %v881_v35 = vadd.f32 %v865_v18, %v849_v20  ;;  %v369_v38 = vpop.f32.mrb[5].mxu1 }
  0xea   :  { %v375_v36 = vadd.f32 %v1401_v28, %v1775_v45  ;;  %v219_v37 = vadd.f32 %v1770_v44, %v218_v29  ;;  %v816_v39 = vmul.f32 %v784_v9, %v360_v26  ;;  %v848_v40 = vmul.f32 %v768_v8, %v360_v26 }
  0xeb   :  { %v803_v41 = vmul.f32 %v771_v24, %v224_v27  ;;  %v867_v42 = vmul.f32 %v787_v25, %v224_v27  ;;  %897 = vst.msk [vmem:[%s2569_s8 + $0x18] sm:$0xff] %vm83_vm0, %v833_v34  ;;  %913 = vst.msk [vmem:[%s2570_s9 + $0x18] sm:$0xff] %vm83_vm0, %v881_v35  ;;  %v1372_v49 = vpop.f32.mrb[6].mxu0  ;;  %v370_v52 = vadd.f32 %v1775_v45, %v369_v38 }
  0xec   :  { %v819_v43 = vmul.f32 %v787_v25, %v375_v36  ;;  %v851_v46 = vmul.f32 %v771_v24, %v375_v36  ;;  %v802_v47 = vmul.f32 %v770_v30, %v219_v37  ;;  %v866_v48 = vmul.f32 %v786_v31, %v219_v37  ;;  %v1404_v56 = vpop.f32.mrb[6].mxu1  ;;  %v228_v57 = vpop.f32.mrb[7].mxu0 }
  0xed   :  { %v1854_v50 = vsub.f32 %v800_v21, %v816_v39  ;;  %v1856_v51 = vadd.f32 %v864_v22, %v848_v40  ;;  %v991_v53 = vadd.f32 %v975_v33, %v959_v32  ;;  %v234_v60 = vadd.f32 %v1372_v49, %v1770_v44  ;;  %v379_v0 = vpop.f32.mrb[7].mxu1  ;;  %v775_v22 = vld [vmem:[%s2567_s2 + $0x48] sm:$0xff]  ;;  %v790_v32 = vld [vmem:[%s2568_s3 + $0x40] sm:$0xff] }
  0xee   :  { %v1865_v58 = vsub.f32 %v803_v41, %v819_v43  ;;  %v1867_v59 = vadd.f32 %v867_v42, %v851_v46  ;;  %v385_v61 = vadd.f32 %v1404_v56, %v1775_v45  ;;  %v818_v1 = vmul.f32 %v786_v31, %v370_v52  ;;  %v774_v31 = vld [vmem:[%s2567_s2 + $0x40] sm:$0xff]  ;;  %v777_v56 = vld [vmem:[%s2567_s2 + $0x58] sm:$0xff] }
  0xef   :  { %896 = vst.msk [vmem:[%s2569_s8 + $0x10] sm:$0xff] %vm83_vm0, %v1854_v50  ;;  %912 = vst.msk [vmem:[%s2570_s9 + $0x10] sm:$0xff] %vm83_vm0, %v1856_v51  ;;  %v850_v2 = vmul.f32 %v770_v30, %v370_v52  ;;  %v1009_v3 = vsel %vm83_vm0, %v991_v53, 0.0  ;;  %v229_v4 = vadd.f32 %v1770_v44, %v228_v57  ;;  %v805_v5 = vmul.f32 %v773_v54, %v234_v60  ;;  %v1375_v9 = vpop.f32.mrb[8].mxu0  ;;  %v793_v57 = vld [vmem:[%s2568_s3 + $0x58] sm:$0xff] }
  0xf0   :  { %899 = vst.msk [vmem:[%s2569_s8 + $0x28] sm:$0xff] %vm83_vm0, %v1865_v58  ;;  %915 = vst.msk [vmem:[%s2570_s9 + $0x28] sm:$0xff] %vm83_vm0, %v1867_v59  ;;  %1010 = vadd.xlane.f32.xlu0 %v1009_v3  ;;  %v869_v6 = vmul.f32 %v789_v55, %v234_v60  ;;  %v821_v7 = vmul.f32 %v789_v55, %v385_v61  ;;  %v853_v8 = vmul.f32 %v773_v54, %v385_v61  ;;  %v1407_v14 = vpop.f32.mrb[8].mxu1  ;;  %v238_v17 = vpop.f32.mrb[9].mxu0 }
  0xf1   :  { %v1899_v10 = vsub.f32 %v802_v47, %v818_v1  ;;  %v1901_v11 = vadd.f32 %v866_v48, %v850_v2  ;;  %v804_v12 = vmul.f32 %v772_v62, %v229_v4  ;;  %v868_v13 = vmul.f32 %v788_v63, %v229_v4  ;;  %v389_v24 = vpop.f32.mrb[9].mxu1  ;;  %v776_v1 = vld [vmem:[%s2567_s2 + $0x50] sm:$0xff] }
  0xf2   :  { %v1903_v18 = vsub.f32 %v805_v5, %v821_v7  ;;  %v1905_v19 = vadd.f32 %v869_v6, %v853_v8  ;;  %v380_v20 = vadd.f32 %v1775_v45, %v379_v0  ;;  %v961_v21 = vmul.f32 %v833_v34, %v833_v34  ;;  %v792_v5 = vld [vmem:[%s2568_s3 + $0x50] sm:$0xff] }
  0xf3   :  { %898 = vst.msk [vmem:[%s2569_s8 + $0x20] sm:$0xff] %vm83_vm0, %v1899_v10  ;;  %914 = vst.msk [vmem:[%s2570_s9 + $0x20] sm:$0xff] %vm83_vm0, %v1901_v11  ;;  %v977_v25 = vmul.f32 %v881_v35, %v881_v35  ;;  %v958_v26 = vmul.f32 %v1808_v15, %v1808_v15  ;;  %v974_v27 = vmul.f32 %v1810_v16, %v1810_v16  ;;  %v1378_v33 = vpop.f32.mrb[10].mxu0 }
  0xf4   :  { %v244_v28 = vadd.f32 %v1375_v9, %v1770_v44  ;;  %901 = vst.msk [vmem:[%s2569_s8 + $0x38] sm:$0xff] %vm83_vm0, %v1903_v18  ;;  %917 = vst.msk [vmem:[%s2570_s9 + $0x38] sm:$0xff] %vm83_vm0, %v1905_v19  ;;  %v820_v29 = vmul.f32 %v788_v63, %v380_v20  ;;  %v852_v30 = vmul.f32 %v772_v62, %v380_v20  ;;  %v1410_v38 = vpop.f32.mrb[10].mxu1  ;;  %v248_v39 = vpop.f32.mrb[11].mxu0 }
  0xf5   :  { %v395_v15 = vadd.f32 %v1407_v14, %v1775_v45  ;;  %v239_v16 = vadd.f32 %v1770_v44, %v238_v17  ;;  %v993_v34 = vadd.f32 %v977_v25, %v961_v21  ;;  %v990_v35 = vadd.f32 %v974_v27, %v958_v26  ;;  %v399_v46 = vpop.f32.mrb[11].mxu1 }
  0xf6   :  { %v807_v36 = vmul.f32 %v775_v22, %v244_v28  ;;  %v871_v37 = vmul.f32 %v791_v23, %v244_v28  ;;  %v1947_v40 = vsub.f32 %v804_v12, %v820_v29  ;;  %v1949_v41 = vadd.f32 %v868_v13, %v852_v30 }
  0xf7   :  { %v823_v42 = vmul.f32 %v791_v23, %v395_v15  ;;  %v855_v43 = vmul.f32 %v775_v22, %v395_v15  ;;  %v1015_v47 = vsel %vm83_vm0, %v993_v34, 0.0  ;;  %v1006_v48 = vsel %vm83_vm0, %v990_v35, 0.0  ;;  %v1381_v60 = vpop.f32.mrb[12].mxu0 }
  0xf8   :  { %v806_v49 = vmul.f32 %v774_v31, %v239_v16  ;;  %v870_v52 = vmul.f32 %v790_v32, %v239_v16  ;;  %900 = vst.msk [vmem:[%s2569_s8 + $0x30] sm:$0xff] %vm83_vm0, %v1947_v40  ;;  %916 = vst.msk [vmem:[%s2570_s9 + $0x30] sm:$0xff] %vm83_vm0, %v1949_v41  ;;  %1016 = vadd.xlane.f32.xlu1 %v1015_v47  ;;  %1007 = vadd.xlane.f32.xlu0 %v1006_v48  ;;  %v1413_v2 = vpop.f32.mrb[12].mxu1  ;;  %v258_v3 = vpop.f32.mrb[13].mxu0 }
  0xf9   :  { %v1963_v53 = vsub.f32 %v807_v36, %v823_v42  ;;  %v1965_v54 = vadd.f32 %v871_v37, %v855_v43  ;;  %v390_v55 = vadd.f32 %v1775_v45, %v389_v24  ;;  %v960_v61 = vmul.f32 %v1854_v50, %v1854_v50  ;;  %v409_v7 = vpop.f32.mrb[13].mxu1  ;;  %v778_v36 = vld [vmem:[%s2567_s2 + $0x60] sm:$0xff] }
  0xfa   :  { %v976_v62 = vmul.f32 %v1856_v51, %v1856_v51  ;;  %v254_v63 = vadd.f32 %v1378_v33, %v1770_v44  ;;  %v405_v0 = vadd.f32 %v1410_v38, %v1775_v45  ;;  %v249_v4 = vadd.f32 %v1770_v44, %v248_v39 }
  0xfb   :  { %903 = vst.msk [vmem:[%s2569_s8 + $0x48] sm:$0xff] %vm83_vm0, %v1963_v53  ;;  %919 = vst.msk [vmem:[%s2570_s9 + $0x48] sm:$0xff] %vm83_vm0, %v1965_v54  ;;  %v822_v50 = vmul.f32 %v790_v32, %v390_v55  ;;  %v854_v51 = vmul.f32 %v774_v31, %v390_v55  ;;  %v400_v6 = vadd.f32 %v1775_v45, %v399_v46  ;;  %v2002_v22 = vpop.f32.mrb[14].mxu0  ;;  %v779_v31 = vld [vmem:[%s2567_s2 + $0x68] sm:$0xff] }
  0xfc   :  { %v992_v8 = vadd.f32 %v976_v62, %v960_v61  ;;  %v809_v9 = vmul.f32 %v777_v56, %v254_v63  ;;  %v873_v12 = vmul.f32 %v793_v57, %v254_v63  ;;  %v825_v13 = vmul.f32 %v793_v57, %v405_v0  ;;  %v1416_v27 = vpop.f32.mrb[14].mxu1  ;;  %v268_v28 = vpop.f32.mrb[15].mxu0  ;;  %v795_v32 = vld [vmem:[%s2568_s3 + $0x68] sm:$0xff] }
  0xfd   :  { %v1998_v14 = vsub.f32 %v806_v49, %v822_v50  ;;  %v2000_v17 = vadd.f32 %v870_v52, %v854_v51  ;;  %v857_v20 = vmul.f32 %v777_v56, %v405_v0  ;;  %v808_v21 = vmul.f32 %v776_v1, %v249_v4  ;;  %v419_v33 = vpop.f32.mrb[15].mxu1 }
  0xfe   :  { %v1012_v23 = vsel %vm83_vm0, %v992_v8, 0.0  ;;  %v2005_v24 = vsub.f32 %v809_v9, %v825_v13  ;;  %v872_v25 = vmul.f32 %v792_v5, %v249_v4  ;;  %v824_v26 = vmul.f32 %v792_v5, %v400_v6  ;;  %v781_v9 = vld [vmem:[%s2567_s2 + $0x78] sm:$0xff] }
  0xff   :  { %902 = vst.msk [vmem:[%s2569_s8 + $0x40] sm:$0xff] %vm83_vm0, %v1998_v14  ;;  %918 = vst.msk [vmem:[%s2570_s9 + $0x40] sm:$0xff] %vm83_vm0, %v2000_v17  ;;  %1013 = vadd.xlane.f32.xlu1 %v1012_v23  ;;  %v2017_v29 = vadd.f32 %v873_v12, %v857_v20  ;;  %v856_v30 = vmul.f32 %v776_v1, %v400_v6  ;;  %v962_v15 = vmul.f32 %v1899_v10, %v1899_v10  ;;  %v2056_v42 = vpop.f32.mrb[16].mxu0  ;;  %v796_v23 = vld [vmem:[%s2568_s3 + $0x70] sm:$0xff] }
 0x100   :  { %v978_v16 = vmul.f32 %v1901_v11, %v1901_v11  ;;  %905 = vst.msk [vmem:[%s2569_s8 + $0x58] sm:$0xff] %vm83_vm0, %v2005_v24  ;;  %v2034_v34 = vsub.f32 %v808_v21, %v824_v26  ;;  %v963_v10 = vmul.f32 %v1865_v58, %v1865_v58  ;;  %v979_v11 = vmul.f32 %v1867_v59, %v1867_v59  ;;  %v794_v59 = vld [vmem:[%s2568_s3 + $0x60] sm:$0xff]  ;;  %v2064_v49 = vpop.f32.mrb[16].mxu1  ;;  %v2066_v52 = vpop.f32.mrb[17].mxu0  ;;  %v780_v21 = vld [vmem:[%s2567_s2 + $0x70] sm:$0xff] }
 0x101   :  { %v264_v35 = vadd.f32 %v1381_v60, %v1770_v44  ;;  %921 = vst.msk [vmem:[%s2570_s9 + $0x58] sm:$0xff] %vm83_vm0, %v2017_v29  ;;  %v2049_v37 = vadd.f32 %v872_v25, %v856_v30  ;;  %v415_v58 = vadd.f32 %v1413_v2, %v1775_v45  ;;  %v259_v39 = vadd.f32 %v1770_v44, %v258_v3  ;;  %v2074_v61 = vpop.f32.mrb[17].mxu1 }
 0x102   :  { %v994_v38 = vadd.f32 %v978_v16, %v962_v15  ;;  %904 = vst.msk [vmem:[%s2569_s8 + $0x50] sm:$0xff] %vm83_vm0, %v2034_v34  ;;  %v995_v43 = vadd.f32 %v979_v11, %v963_v10  ;;  %v410_v48 = vadd.f32 %v1775_v45, %v409_v7  ;;  %v964_v50 = vmul.f32 %v1947_v40, %v1947_v40  ;;  %v797_v40 = vld [vmem:[%s2568_s3 + $0x78] sm:$0xff] }
 0x103   :  { %v811_v46 = vmul.f32 %v779_v31, %v264_v35  ;;  %v875_v47 = vmul.f32 %v795_v32, %v264_v35  ;;  %920 = vst.msk [vmem:[%s2570_s9 + $0x50] sm:$0xff] %vm83_vm0, %v2049_v37  ;;  %v827_v56 = vmul.f32 %v795_v32, %v415_v58  ;;  %v859_v57 = vmul.f32 %v779_v31, %v415_v58  ;;  %v2085_v4 = vpop.f32.mrb[18].mxu0 }
 0x104   :  { %v1018_v55 = vsel %vm83_vm0, %v994_v38, 0.0  ;;  %v810_v60 = vmul.f32 %v778_v36, %v259_v39  ;;  %v1021_v62 = vsel %vm83_vm0, %v995_v43, 0.0  ;;  %v874_v63 = vmul.f32 %v794_v59, %v259_v39  ;;  %v2103_v12 = vpop.f32.mrb[19].mxu0 }
 0x105   :  { %1019 = vadd.xlane.f32.xlu0 %v1018_v55  ;;  %v826_v0 = vmul.f32 %v794_v59, %v410_v48  ;;  %v858_v1 = vmul.f32 %v778_v36, %v410_v48  ;;  %1022 = vadd.xlane.f32.xlu1 %v1021_v62  ;;  %v2077_v2 = vsub.f32 %v811_v46, %v827_v56 }
 0x106   :  { %v2079_v3 = vadd.f32 %v875_v47, %v859_v57  ;;  %v980_v51 = vmul.f32 %v1949_v41, %v1949_v41  ;;  %v965_v7 = vmul.f32 %v1903_v18, %v1903_v18  ;;  %v981_v8 = vmul.f32 %v1905_v19, %v1905_v19  ;;  %v2101_v41 = vpop.f32.mrb[18].mxu1 }
 0x107   :  { %v2087_v5 = vsub.f32 %v810_v60, %v826_v0  ;;  %v2089_v6 = vadd.f32 %v874_v63, %v858_v1  ;;  %907 = vst.msk [vmem:[%s2569_s8 + $0x68] sm:$0xff] %vm83_vm0, %v2077_v2  ;;  %v274_v19 = vadd.f32 %v2002_v22, %v1770_v44  ;;  %v425_v13 = vadd.f32 %v1416_v27, %v1775_v45  ;;  %v2125_v25 = vpop.f32.mrb[19].mxu1  ;;  %v2143_v32 = vpop.f32.mrb[20].mxu0 }
 0x108   :  { %923 = vst.msk [vmem:[%s2570_s9 + $0x68] sm:$0xff] %vm83_vm0, %v2079_v3  ;;  %v996_v18 = vadd.f32 %v980_v51, %v964_v50  ;;  %v269_v20 = vadd.f32 %v1770_v44, %v268_v28  ;;  %v997_v22 = vadd.f32 %v981_v8, %v965_v7  ;;  %v420_v26 = vadd.f32 %v1775_v45, %v419_v33  ;;  %v2146_v33 = vpop.f32.mrb[20].mxu1  ;;  %v2148_v38 = vpop.f32.mrb[21].mxu0 }
 0x109   :  { %906 = vst.msk [vmem:[%s2569_s8 + $0x60] sm:$0xff] %vm83_vm0, %v2087_v5  ;;  %922 = vst.msk [vmem:[%s2570_s9 + $0x60] sm:$0xff] %vm83_vm0, %v2089_v6  ;;  %v966_v27 = vmul.f32 %v1998_v14, %v1998_v14  ;;  %v982_v28 = vmul.f32 %v2000_v17, %v2000_v17  ;;  %v813_v15 = vmul.f32 %v781_v9, %v274_v19  ;;  %v2152_v59 = vpop.f32.mrb[21].mxu1 }
 0x10a   :  { %v1024_v30 = vsel %vm83_vm0, %v996_v18, 0.0  ;;  %v877_v16 = vmul.f32 %v797_v40, %v274_v19  ;;  %v829_v31 = vmul.f32 %v797_v40, %v425_v13  ;;  %v1027_v10 = vsel %vm83_vm0, %v997_v22, 0.0 }
 0x10b   :  { %1025 = vadd.xlane.f32.xlu0 %v1024_v30  ;;  %v861_v11 = vmul.f32 %v781_v9, %v425_v13  ;;  %v812_v35 = vmul.f32 %v780_v21, %v269_v20  ;;  %v876_v36 = vmul.f32 %v796_v23, %v269_v20  ;;  %1028 = vadd.xlane.f32.xlu1 %v1027_v10 }
 0x10c   :  { %v2150_v14 = vsub.f32 %v813_v15, %v829_v31  ;;  %v828_v17 = vmul.f32 %v796_v23, %v420_v26  ;;  %v860_v58 = vmul.f32 %v780_v21, %v420_v26  ;;  %v998_v39 = vadd.f32 %v982_v28, %v966_v27 }
 0x10d   :  { %v2154_v43 = vadd.f32 %v877_v16, %v861_v11  ;;  %v967_v46 = vmul.f32 %v1963_v53, %v1963_v53  ;;  %v983_v47 = vmul.f32 %v1965_v54, %v1965_v54  ;;  %v968_v48 = vmul.f32 %v2034_v34, %v2034_v34  ;;  %v2170_v53 = vpop.f32.mrb[22].mxu0 }
 0x10e   :  { %909 = vst.msk [vmem:[%s2569_s8 + $0x78] sm:$0xff] %vm83_vm0, %v2150_v14  ;;  %v844_v55 = vsub.f32 %v812_v35, %v828_v17  ;;  %v892_v56 = vadd.f32 %v876_v36, %v860_v58  ;;  %v1030_v57 = vsel %vm83_vm0, %v998_v39, 0.0  ;;  %v984_v60 = vmul.f32 %v2049_v37, %v2049_v37  ;;  %v2183_v37 = vpop.f32.mrb[22].mxu1  ;;  %v2185_v0 = vpop.f32.mrb[23].mxu0 }
 0x10f   :  { %925 = vst.msk [vmem:[%s2570_s9 + $0x78] sm:$0xff] %vm83_vm0, %v2154_v43  ;;  %1031 = vadd.xlane.f32.xlu0 %v1030_v57  ;;  %v999_v54 = vadd.f32 %v983_v47, %v967_v46  ;;  %v969_v34 = vmul.f32 %v2005_v24, %v2005_v24  ;;  %v985_v62 = vmul.f32 %v2017_v29, %v2017_v29  ;;  %v2201_v50 = vpop.f32.mrb[23].mxu1  ;;  %v2223_v40 = vpop.f32.mrb[24].mxu0 }
 0x110   :  { %v548_v63 = vadd.f32 %v2056_v42, %v1770_v44  ;;  %908 = vst.msk [vmem:[%s2569_s8 + $0x70] sm:$0xff] %vm83_vm0, %v844_v55  ;;  %924 = vst.msk [vmem:[%s2570_s9 + $0x70] sm:$0xff] %vm83_vm0, %v892_v56  ;;  %v1000_v24 = vadd.f32 %v984_v60, %v968_v48  ;;  %v693_v29 = vadd.f32 %v2064_v49, %v1775_v45  ;;  %v2232_v21 = vpop.f32.mrb[24].mxu1  ;;  %v2234_v23 = vpop.f32.mrb[25].mxu0 }
 0x111   :  { %v543_v42 = vadd.f32 %v1770_v44, %v2066_v52  ;;  %v688_v1 = vadd.f32 %v1775_v45, %v2074_v61  ;;  %v1033_v51 = vsel %vm83_vm0, %v999_v54, 0.0  ;;  %v1001_v7 = vadd.f32 %v985_v62, %v969_v34 }
 0x112   :  { %927 = vst.msk [vmem:[%s2571_s10 + $0x8] sm:$0xff] %vm83_vm0, %v548_v63  ;;  %v1072_v8 = vmul.f32 %v548_v63, %v548_v63  ;;  %v970_v49 = vmul.f32 %v2087_v5, %v2087_v5  ;;  %1034 = vadd.xlane.f32.xlu1 %v1033_v51  ;;  %v1036_v52 = vsel %vm83_vm0, %v1000_v24, 0.0  ;;  %943 = vst.msk [vmem:[%s2572_s11 + $0x8] sm:$0xff] %vm83_vm0, %v693_v29 }
 0x113   :  { %v1088_v61 = vmul.f32 %v693_v29, %v693_v29  ;;  %926 = vst.msk [vmem:[%s2571_s10] sm:$0xff] %vm83_vm0, %v543_v42  ;;  %v1071_v9 = vmul.f32 %v543_v42, %v543_v42  ;;  %942 = vst.msk [vmem:[%s2572_s11] sm:$0xff] %vm83_vm0, %v688_v1  ;;  %v1087_v5 = vmul.f32 %v688_v1, %v688_v1  ;;  %1037 = vadd.xlane.f32.xlu0 %v1036_v52  ;;  %v2262_v16 = vpop.f32.mrb[26].mxu0 }
 0x114   :  { %v1039_v18 = vsel %vm83_vm0, %v1001_v7, 0.0  ;;  %v986_v19 = vmul.f32 %v2089_v6, %v2089_v6  ;;  %v971_v13 = vmul.f32 %v2077_v2, %v2077_v2  ;;  %v987_v20 = vmul.f32 %v2079_v3, %v2079_v3  ;;  %v2244_v2 = vpop.f32.mrb[25].mxu1  ;;  %v2270_v17 = vpop.f32.mrb[27].mxu0 }
 0x115   :  { %v558_v22 = vadd.f32 %v2085_v4, %v1770_v44  ;;  %v703_v26 = vadd.f32 %v2101_v41, %v1775_v45  ;;  %v553_v27 = vadd.f32 %v1770_v44, %v2103_v12  ;;  %v698_v6 = vadd.f32 %v1775_v45, %v2125_v25  ;;  %v2268_v36 = vpop.f32.mrb[26].mxu1 }
 0x116   :  { %v1002_v28 = vadd.f32 %v986_v19, %v970_v49  ;;  %v1003_v3 = vadd.f32 %v987_v20, %v971_v13  ;;  %v972_v30 = vmul.f32 %v844_v55, %v844_v55  ;;  %v988_v15 = vmul.f32 %v892_v56, %v892_v56  ;;  %1040 = vadd.xlane.f32.xlu1 %v1039_v18  ;;  %v2280_v48 = vpop.f32.mrb[27].mxu1 }
 0x117   :  { %929 = vst.msk [vmem:[%s2571_s10 + $0x18] sm:$0xff] %vm83_vm0, %v558_v22  ;;  %v1074_v4 = vmul.f32 %v558_v22, %v558_v22  ;;  %945 = vst.msk [vmem:[%s2572_s11 + $0x18] sm:$0xff] %vm83_vm0, %v703_v26  ;;  %v1090_v41 = vmul.f32 %v703_v26, %v703_v26  ;;  %v1073_v12 = vmul.f32 %v553_v27, %v553_v27 }
 0x118   :  { %928 = vst.msk [vmem:[%s2571_s10 + $0x10] sm:$0xff] %vm83_vm0, %v553_v27  ;;  %944 = vst.msk [vmem:[%s2572_s11 + $0x10] sm:$0xff] %vm83_vm0, %v698_v6  ;;  %v1089_v25 = vmul.f32 %v698_v6, %v698_v6  ;;  %v1042_v31 = vsel %vm83_vm0, %v1002_v28, 0.0  ;;  %v1045_v10 = vsel %vm83_vm0, %v1003_v3, 0.0  ;;  %v1004_v11 = vadd.f32 %v988_v15, %v972_v30  ;;  %v1477_v34 = vpop.f32.mrb[28].mxu1 }
 0x119   :  { %v973_v35 = vmul.f32 %v2150_v14, %v2150_v14  ;;  %1043 = vadd.xlane.f32.xlu0 %v1042_v31  ;;  %v989_v58 = vmul.f32 %v2154_v43, %v2154_v43  ;;  %v568_v39 = vadd.f32 %v2143_v32, %v1770_v44  ;;  %v713_v46 = vadd.f32 %v2146_v33, %v1775_v45  ;;  %v2297_v33 = vpop.f32.mrb[28].mxu0  ;;  %v747_v1 = vpop.f32.mrb[29].mxu1 }
 0x11a   :  { %v563_v47 = vadd.f32 %v1770_v44, %v2148_v38  ;;  %v1048_v14 = vsel %vm83_vm0, %v1004_v11, 0.0  ;;  %v708_v55 = vadd.f32 %v1775_v45, %v2152_v59  ;;  %v1103_v56 = vadd.f32 %v1087_v5, %v1071_v9  ;;  %1046 = vadd.xlane.f32.xlu1 %v1045_v10  ;;  %v602_v62 = vpop.f32.mrb[29].mxu0 }
 0x11b   :  { %v1104_v57 = vadd.f32 %v1088_v61, %v1072_v8  ;;  %v1005_v43 = vadd.f32 %v989_v58, %v973_v35  ;;  %931 = vst.msk [vmem:[%s2571_s10 + $0x28] sm:$0xff] %vm83_vm0, %v568_v39  ;;  %v1076_v32 = vmul.f32 %v568_v39, %v568_v39  ;;  %947 = vst.msk [vmem:[%s2572_s11 + $0x28] sm:$0xff] %vm83_vm0, %v713_v46  ;;  %v1448_v52 = vpop.f32.mrb[30].mxu0 }
 0x11c   :  { %930 = vst.msk [vmem:[%s2571_s10 + $0x20] sm:$0xff] %vm83_vm0, %v563_v47  ;;  %v1092_v38 = vmul.f32 %v713_v46, %v713_v46  ;;  %v1075_v59 = vmul.f32 %v563_v47, %v563_v47  ;;  %946 = vst.msk [vmem:[%s2572_s11 + $0x20] sm:$0xff] %vm83_vm0, %v708_v55  ;;  %v1091_v60 = vmul.f32 %v708_v55, %v708_v55  ;;  %v1119_v51 = vsel %vm83_vm0, %v1103_v56, 0.0  ;;  %v1480_v18 = vpop.f32.mrb[30].mxu1  ;;  %v612_v19 = vpop.f32.mrb[31].mxu0 }
 0x11d   :  { %v578_v54 = vadd.f32 %v2170_v53, %v1770_v44  ;;  %1049 = vadd.xlane.f32.xlu0 %v1048_v14  ;;  %v1051_v63 = vsel %vm83_vm0, %v1005_v43, 0.0  ;;  %v723_v24 = vadd.f32 %v2183_v37, %v1775_v45  ;;  %v573_v29 = vadd.f32 %v1770_v44, %v2185_v0  ;;  %v757_v26 = vpop.f32.mrb[31].mxu1 }
 0x11e   :  { %v718_v42 = vadd.f32 %v1775_v45, %v2201_v50  ;;  %v1105_v53 = vadd.f32 %v1089_v25, %v1073_v12  ;;  %v1106_v7 = vadd.f32 %v1090_v41, %v1074_v4  ;;  %v588_v8 = vadd.f32 %v2223_v40, %v1770_v44  ;;  %1052 = vadd.xlane.f32.xlu1 %v1051_v63 }
 0x11f   :  { %933 = vst.msk [vmem:[%s2571_s10 + $0x38] sm:$0xff] %vm83_vm0, %v578_v54  ;;  %v1122_v37 = vsel %vm83_vm0, %v1104_v57, 0.0  ;;  %v1078_v0 = vmul.f32 %v578_v54, %v578_v54  ;;  %949 = vst.msk [vmem:[%s2572_s11 + $0x38] sm:$0xff] %vm83_vm0, %v723_v24  ;;  %v1094_v50 = vmul.f32 %v723_v24, %v723_v24  ;;  %v733_v49 = vadd.f32 %v2232_v21, %v1775_v45 }
 0x120   :  { %932 = vst.msk [vmem:[%s2571_s10 + $0x30] sm:$0xff] %vm83_vm0, %v573_v29  ;;  %948 = vst.msk [vmem:[%s2572_s11 + $0x30] sm:$0xff] %vm83_vm0, %v718_v42  ;;  %v1077_v61 = vmul.f32 %v573_v29, %v573_v29  ;;  %v1093_v9 = vmul.f32 %v718_v42, %v718_v42  ;;  %v1125_v5 = vsel %vm83_vm0, %v1105_v53, 0.0  ;;  %v583_v40 = vadd.f32 %v1770_v44, %v2234_v23 }
 0x121   :  { %935 = vst.msk [vmem:[%s2571_s10 + $0x48] sm:$0xff] %vm83_vm0, %v588_v8  ;;  %1120 = vadd.xlane.f32.xlu0 %v1119_v51  ;;  %v1128_v13 = vsel %vm83_vm0, %v1106_v7, 0.0  ;;  %951 = vst.msk [vmem:[%s2572_s11 + $0x48] sm:$0xff] %vm83_vm0, %v733_v49  ;;  %v728_v20 = vadd.f32 %v1775_v45, %v2244_v2  ;;  %v1107_v21 = vadd.f32 %v1091_v60, %v1075_v59 }
 0x122   :  { %v1108_v22 = vadd.f32 %v1092_v38, %v1076_v32  ;;  %934 = vst.msk [vmem:[%s2571_s10 + $0x40] sm:$0xff] %vm83_vm0, %v583_v40  ;;  %v1079_v23 = vmul.f32 %v583_v40, %v583_v40  ;;  %v598_v27 = vadd.f32 %v2262_v16, %v1770_v44  ;;  %v743_v6 = vadd.f32 %v2268_v36, %v1775_v45 }
 0x123   :  { %v593_v28 = vadd.f32 %v1770_v44, %v2270_v17  ;;  %1123 = vadd.xlane.f32.xlu1 %v1122_v37  ;;  %v1080_v2 = vmul.f32 %v588_v8, %v588_v8  ;;  %v1096_v3 = vmul.f32 %v733_v49, %v733_v49  ;;  %950 = vst.msk [vmem:[%s2572_s11 + $0x40] sm:$0xff] %vm83_vm0, %v728_v20  ;;  %v1131_v4 = vsel %vm83_vm0, %v1107_v21, 0.0 }
 0x124   :  { %v1095_v30 = vmul.f32 %v728_v20, %v728_v20  ;;  %v738_v15 = vadd.f32 %v1775_v45, %v2280_v48  ;;  %937 = vst.msk [vmem:[%s2571_s10 + $0x58] sm:$0xff] %vm83_vm0, %v598_v27  ;;  %v1082_v41 = vmul.f32 %v598_v27, %v598_v27  ;;  %953 = vst.msk [vmem:[%s2572_s11 + $0x58] sm:$0xff] %vm83_vm0, %v743_v6  ;;  %v1134_v48 = vsel %vm83_vm0, %v1108_v22, 0.0 }
 0x125   :  { %v1098_v12 = vmul.f32 %v743_v6, %v743_v6  ;;  %936 = vst.msk [vmem:[%s2571_s10 + $0x50] sm:$0xff] %vm83_vm0, %v593_v28  ;;  %v1109_v25 = vadd.f32 %v1093_v9, %v1077_v61  ;;  %1126 = vadd.xlane.f32.xlu0 %v1125_v5  ;;  %v1081_v16 = vmul.f32 %v593_v28, %v593_v28 }
 0x126   :  { %952 = vst.msk [vmem:[%s2572_s11 + $0x50] sm:$0xff] %vm83_vm0, %v738_v15  ;;  %v1110_v31 = vadd.f32 %v1094_v50, %v1078_v0  ;;  %v608_v10 = vadd.f32 %v2297_v33, %v1770_v44  ;;  %v753_v11 = vadd.f32 %v1477_v34, %v1775_v45  ;;  %v1097_v35 = vmul.f32 %v738_v15, %v738_v15 }
 0x127   :  { %v603_v36 = vadd.f32 %v1770_v44, %v602_v62  ;;  %v748_v17 = vadd.f32 %v1775_v45, %v747_v1  ;;  %v1111_v58 = vadd.f32 %v1095_v30, %v1079_v23  ;;  %1129 = vadd.xlane.f32.xlu1 %v1128_v13  ;;  %v1112_v47 = vadd.f32 %v1096_v3, %v1080_v2 }
 0x128   :  { %939 = vst.msk [vmem:[%s2571_s10 + $0x68] sm:$0xff] %vm83_vm0, %v608_v10  ;;  %v1084_v39 = vmul.f32 %v608_v10, %v608_v10  ;;  %955 = vst.msk [vmem:[%s2572_s11 + $0x68] sm:$0xff] %vm83_vm0, %v753_v11  ;;  %v1100_v46 = vmul.f32 %v753_v11, %v753_v11  ;;  %v618_v56 = vadd.f32 %v1448_v52, %v1770_v44  ;;  %v1137_v57 = vsel %vm83_vm0, %v1109_v25, 0.0 }
 0x129   :  { %938 = vst.msk [vmem:[%s2571_s10 + $0x60] sm:$0xff] %vm83_vm0, %v603_v36  ;;  %v1083_v14 = vmul.f32 %v603_v36, %v603_v36  ;;  %954 = vst.msk [vmem:[%s2572_s11 + $0x60] sm:$0xff] %vm83_vm0, %v748_v17  ;;  %v1099_v55 = vmul.f32 %v748_v17, %v748_v17  ;;  %1132 = vadd.xlane.f32.xlu0 %v1131_v4  ;;  %v763_v43 = vadd.f32 %v1480_v18, %v1775_v45 }
 0x12a   :  { %v613_v32 = vadd.f32 %v1770_v44, %v612_v19  ;;  %v758_v33 = vadd.f32 %v1775_v45, %v757_v26  ;;  %941 = vst.msk [vmem:[%s2571_s10 + $0x78] sm:$0xff] %vm83_vm0, %v618_v56  ;;  %v1086_v38 = vmul.f32 %v618_v56, %v618_v56  ;;  %v1113_v59 = vadd.f32 %v1097_v35, %v1081_v16 }
 0x12b   :  { %v1114_v60 = vadd.f32 %v1098_v12, %v1082_v41  ;;  %v1115_v54 = vadd.f32 %v1099_v55, %v1083_v14  ;;  %1135 = vadd.xlane.f32.xlu1 %v1134_v48  ;;  %957 = vst.msk [vmem:[%s2572_s11 + $0x78] sm:$0xff] %vm83_vm0, %v763_v43  ;;  %v1102_v34 = vmul.f32 %v763_v43, %v763_v43  ;;  %v1140_v63 = vsel %vm83_vm0, %v1110_v31, 0.0 }
 0x12c   :  { %940 = vst.msk [vmem:[%s2571_s10 + $0x70] sm:$0xff] %vm83_vm0, %v613_v32  ;;  %v1085_v44 = vmul.f32 %v613_v32, %v613_v32  ;;  %956 = vst.msk [vmem:[%s2572_s11 + $0x70] sm:$0xff] %vm83_vm0, %v758_v33  ;;  %v1101_v45 = vmul.f32 %v758_v33, %v758_v33  ;;  %v1116_v62 = vadd.f32 %v1100_v46, %v1084_v39  ;;  %v1143_v42 = vsel %vm83_vm0, %v1111_v58, 0.0 }
 0x12d   :  { %1138 = vadd.xlane.f32.xlu0 %v1137_v57  ;;  %v1118_v29 = vadd.f32 %v1102_v34, %v1086_v38  ;;  %v1146_v1 = vsel %vm83_vm0, %v1112_v47, 0.0  ;;  %v1149_v51 = vsel %vm83_vm0, %v1113_v59, 0.0  ;;  %v1152_v53 = vsel %vm83_vm0, %v1114_v60, 0.0 }
 0x12e   :  { %v1117_v24 = vadd.f32 %v1101_v45, %v1085_v44  ;;  %v1155_v7 = vsel %vm83_vm0, %v1115_v54, 0.0  ;;  %v1158_v8 = vsel %vm83_vm0, %v1116_v62, 0.0 }
 0x12f   :  { %1141 = vadd.xlane.f32.xlu1 %v1140_v63  ;;  %v1164_v0 = vsel %vm83_vm0, %v1118_v29, 0.0 }
 0x130   :  { %v1161_v37 = vsel %vm83_vm0, %v1117_v24, 0.0 }
 0x131   :  { %1144 = vadd.xlane.f32.xlu0 %v1143_v42 }
 0x133   :  { %1147 = vadd.xlane.f32.xlu1 %v1146_v1 }
 0x135   :  { %1150 = vadd.xlane.f32.xlu0 %v1149_v51 }
 0x137   :  { %1153 = vadd.xlane.f32.xlu1 %v1152_v53 }
 0x139   :  { %1156 = vadd.xlane.f32.xlu0 %v1155_v7 }
 0x13b   :  { %1159 = vadd.xlane.f32.xlu1 %v1158_v8 }
 0x13d   :  { %1162 = vadd.xlane.f32.xlu0 %v1161_v37 }
 0x13f   :  { %1165 = vadd.xlane.f32.xlu1 %v1164_v0 }
 0x17d   :  { %v1011_v50 = vpop.xlane.xlu0 %1010 }
 0x17e   :  { %1056 = vst.msk [vmem:[%s2573_s12 + $0x8] sm:$0xff] %vm1054_vm1, %v1011_v50 }
 0x185   :  { %v1017_v49 = vpop.xlane.xlu1 %1016  ;;  %v1008_v52 = vpop.xlane.xlu0 %1007 }
 0x186   :  { %1058 = vst.msk [vmem:[%s2573_s12 + $0x18] sm:$0xff] %vm1054_vm1, %v1017_v49  ;;  %1055 = vst.msk [vmem:[%s2573_s12] sm:$0xff] %vm1054_vm1, %v1008_v52 }
 0x18c   :  { %v1014_v61 = vpop.xlane.xlu1 %1013 }
 0x18d   :  { %1057 = vst.msk [vmem:[%s2573_s12 + $0x10] sm:$0xff] %vm1054_vm1, %v1014_v61 }
 0x192   :  { %v1020_v9 = vpop.xlane.xlu0 %1019  ;;  %v1023_v5 = vpop.xlane.xlu1 %1022 }
 0x193   :  { %1059 = vst.msk [vmem:[%s2573_s12 + $0x20] sm:$0xff] %vm1054_vm1, %v1020_v9  ;;  %1060 = vst.msk [vmem:[%s2573_s12 + $0x28] sm:$0xff] %vm1054_vm1, %v1023_v5 }
 0x198   :  { %v1026_v40 = vpop.xlane.xlu0 %1025  ;;  %v1029_v18 = vpop.xlane.xlu1 %1028 }
 0x199   :  { %1061 = vst.msk [vmem:[%s2573_s12 + $0x30] sm:$0xff] %vm1054_vm1, %v1026_v40  ;;  %1062 = vst.msk [vmem:[%s2573_s12 + $0x38] sm:$0xff] %vm1054_vm1, %v1029_v18 }
 0x19c   :  { %v1032_v19 = vpop.xlane.xlu0 %1031 }
 0x19d   :  { %1063 = vst.msk [vmem:[%s2573_s12 + $0x40] sm:$0xff] %vm1054_vm1, %v1032_v19 }
 0x19f   :  { %v1035_v13 = vpop.xlane.xlu1 %1034 }
 0x1a0   :  { %1064 = vst.msk [vmem:[%s2573_s12 + $0x48] sm:$0xff] %vm1054_vm1, %v1035_v13  ;;  %v1038_v20 = vpop.xlane.xlu0 %1037 }
 0x1a1   :  { %1065 = vst.msk [vmem:[%s2573_s12 + $0x50] sm:$0xff] %vm1054_vm1, %v1038_v20 }
 0x1a3   :  { %v1041_v21 = vpop.xlane.xlu1 %1040 }
 0x1a4   :  { %1066 = vst.msk [vmem:[%s2573_s12 + $0x58] sm:$0xff] %vm1054_vm1, %v1041_v21 }
 0x1a6   :  { %v1044_v22 = vpop.xlane.xlu0 %1043 }
 0x1a7   :  { %1067 = vst.msk [vmem:[%s2573_s12 + $0x60] sm:$0xff] %vm1054_vm1, %v1044_v22  ;;  %v1047_v26 = vpop.xlane.xlu1 %1046 }
 0x1a8   :  { %1068 = vst.msk [vmem:[%s2573_s12 + $0x68] sm:$0xff] %vm1054_vm1, %v1047_v26 }
 0x1aa   :  { %v1050_v23 = vpop.xlane.xlu0 %1049 }
 0x1ab   :  { %1069 = vst.msk [vmem:[%s2573_s12 + $0x70] sm:$0xff] %vm1054_vm1, %v1050_v23  ;;  %v1053_v27 = vpop.xlane.xlu1 %1052 }
 0x1ac   :  { %1070 = vst.msk [vmem:[%s2573_s12 + $0x78] sm:$0xff] %vm1054_vm1, %v1053_v27 }
 0x1ae   :  { %v1121_v6 = vpop.xlane.xlu0 %1120 }
 0x1af   :  { %1167 = vst.msk [vmem:[%s2574_s13] sm:$0xff] %vm1054_vm1, %v1121_v6 }
 0x1b0   :  { %v1124_v28 = vpop.xlane.xlu1 %1123 }
 0x1b1   :  { %1168 = vst.msk [vmem:[%s2574_s13 + $0x8] sm:$0xff] %vm1054_vm1, %v1124_v28 }
 0x1b2   :  { %v1127_v2 = vpop.xlane.xlu0 %1126 }
 0x1b3   :  { %1169 = vst.msk [vmem:[%s2574_s13 + $0x10] sm:$0xff] %vm1054_vm1, %v1127_v2 }
 0x1b4   :  { %v1130_v3 = vpop.xlane.xlu1 %1129 }
 0x1b5   :  { %1170 = vst.msk [vmem:[%s2574_s13 + $0x18] sm:$0xff] %vm1054_vm1, %v1130_v3 }
 0x1b6   :  { %v1133_v30 = vpop.xlane.xlu0 %1132 }
 0x1b7   :  { %1171 = vst.msk [vmem:[%s2574_s13 + $0x20] sm:$0xff] %vm1054_vm1, %v1133_v30 }
 0x1b8   :  { %v1136_v15 = vpop.xlane.xlu1 %1135 }
 0x1b9   :  { %1172 = vst.msk [vmem:[%s2574_s13 + $0x28] sm:$0xff] %vm1054_vm1, %v1136_v15 }
 0x1ba   :  { %v1139_v4 = vpop.xlane.xlu0 %1138 }
 0x1bb   :  { %1173 = vst.msk [vmem:[%s2574_s13 + $0x30] sm:$0xff] %vm1054_vm1, %v1139_v4 }
 0x1bc   :  { %v1142_v41 = vpop.xlane.xlu1 %1141 }
 0x1bd   :  { %1174 = vst.msk [vmem:[%s2574_s13 + $0x38] sm:$0xff] %vm1054_vm1, %v1142_v41 }
 0x1be   :  { %v1145_v12 = vpop.xlane.xlu0 %1144 }
 0x1bf   :  { %1175 = vst.msk [vmem:[%s2574_s13 + $0x40] sm:$0xff] %vm1054_vm1, %v1145_v12 }
 0x1c0   :  { %v1148_v25 = vpop.xlane.xlu1 %1147 }
 0x1c1   :  { %1176 = vst.msk [vmem:[%s2574_s13 + $0x48] sm:$0xff] %vm1054_vm1, %v1148_v25 }
 0x1c2   :  { %v1151_v16 = vpop.xlane.xlu0 %1150 }
 0x1c3   :  { %1177 = vst.msk [vmem:[%s2574_s13 + $0x50] sm:$0xff] %vm1054_vm1, %v1151_v16 }
 0x1c4   :  { %v1154_v31 = vpop.xlane.xlu1 %1153 }
 0x1c5   :  { %1178 = vst.msk [vmem:[%s2574_s13 + $0x58] sm:$0xff] %vm1054_vm1, %v1154_v31 }
 0x1c6   :  { %v1157_v10 = vpop.xlane.xlu0 %1156 }
 0x1c7   :  { %1179 = vst.msk [vmem:[%s2574_s13 + $0x60] sm:$0xff] %vm1054_vm1, %v1157_v10 }
 0x1c8   :  { %v1160_v11 = vpop.xlane.xlu1 %1159 }
 0x1c9   :  { %1180 = vst.msk [vmem:[%s2574_s13 + $0x68] sm:$0xff] %vm1054_vm1, %v1160_v11 }
 0x1ca   :  { %v1163_v35 = vpop.xlane.xlu0 %1162 }
 0x1cb   :  { %1181 = vst.msk [vmem:[%s2574_s13 + $0x70] sm:$0xff] %vm1054_vm1, %v1163_v35 }
 0x1cc   :  { %v1166_v36 = vpop.xlane.xlu1 %1165 }
 0x1cd   :  { %1182 = vst.msk [vmem:[%s2574_s13 + $0x78] sm:$0xff] %vm1054_vm1, %v1166_v36 }

</bundles_post_ra>
